<compile_context>
chip_gen: v7x
topology: tpu7x:2x2x1
jax: 0.10.0
libtpu: 0.0.40
codegen_flags: <defaults>
</compile_context>

<pallas_src>
import functools

import jax
import jax.numpy as jnp
from jax import lax
from jax.experimental import pallas as pl
from jax.experimental.pallas import tpu as pltpu

_BF16 = jnp.bfloat16
_F32 = jnp.float32
_ARB1 = pltpu.CompilerParams(dimension_semantics=("arbitrary",))


def _largest_tile(m, cands=(512, 256, 128, 64, 32, 16, 8)):
    for c in cands:
        if m % c == 0:
            return c
    return m


# -----------------------------------------------------------------------------
# Kernel 1: fused dense projections  y_i = x @ W_i + b_i  for ent / rel / rel1
# (x is read from HBM once; weights are bf16 and resident across the M grid).
# -----------------------------------------------------------------------------
def _proj3_kernel(x_ref, we_ref, be_ref, wr_ref, br_ref, w1_ref, b1_ref,
                  oe_ref, or_ref, o1_ref):
    x = x_ref[...].astype(_BF16)
    oe_ref[...] = jnp.dot(x, we_ref[...], preferred_element_type=_F32) + be_ref[...]
    or_ref[...] = jnp.dot(x, wr_ref[...], preferred_element_type=_F32) + br_ref[...]
    o1_ref[...] = jnp.dot(x, w1_ref[...], preferred_element_type=_F32) + b1_ref[...]


def fused_projections(x2d, we, be, wr, br, w1, b1):
    M, H = x2d.shape
    Oe, Or, O1 = we.shape[1], wr.shape[1], w1.shape[1]
    tm = _largest_tile(M)
    return pl.pallas_call(
        _proj3_kernel,
        out_shape=(jax.ShapeDtypeStruct((M, Oe), _F32),
                   jax.ShapeDtypeStruct((M, Or), _F32),
                   jax.ShapeDtypeStruct((M, O1), _F32)),
        grid=(M // tm,),
        in_specs=[
            pl.BlockSpec((tm, H), lambda i: (i, 0)),
            pl.BlockSpec((H, Oe), lambda i: (0, 0)),
            pl.BlockSpec((1, Oe), lambda i: (0, 0)),
            pl.BlockSpec((H, Or), lambda i: (0, 0)),
            pl.BlockSpec((1, Or), lambda i: (0, 0)),
            pl.BlockSpec((H, O1), lambda i: (0, 0)),
            pl.BlockSpec((1, O1), lambda i: (0, 0)),
        ],
        out_specs=(pl.BlockSpec((tm, Oe), lambda i: (i, 0)),
                   pl.BlockSpec((tm, Or), lambda i: (i, 0)),
                   pl.BlockSpec((tm, O1), lambda i: (i, 0))),
        compiler_params=pltpu.CompilerParams(dimension_semantics=("parallel",)),
    )(x2d, we.astype(_BF16), be.reshape(1, Oe),
      wr.astype(_BF16), br.reshape(1, Or),
      w1.astype(_BF16), b1.reshape(1, O1))


# -----------------------------------------------------------------------------
# In-kernel RoPE on the whole projection slab (VPU only — no MXU rotation).
#   rot(v)[2i] = -v[2i+1], rot(v)[2i+1] = v[2i]
# Implemented with ±1 lane shifts (slice+concat; exact semantics) and an
# even/odd lane select.  Head boundaries are even so pairs never straddle them.
# -----------------------------------------------------------------------------
def _rotate_pairs(v):
    left = jnp.concatenate([v[:, 1:], v[:, :1]], axis=1)     # v[j+1]
    right = jnp.concatenate([v[:, -1:], v[:, :-1]], axis=1)  # v[j-1]
    lane = jax.lax.broadcasted_iota(jnp.int32, v.shape, 1)
    return jnp.where(lane % 2 == 0, -left, right)


def _rope_slab(v, cos_slab, sin_slab):
    return v * cos_slab + _rotate_pairs(v) * sin_slab


# -----------------------------------------------------------------------------
# Kernel 2 ('ent'): per-batch, all heads: slab RoPE + bilinear  rot(k) @ rot(q)^T
#   proj layout per head h: lanes [h*2D, h*2D+D) = q, [h*2D+D, (h+1)*2D) = k
# -----------------------------------------------------------------------------
def _ent_heads_kernel(proj_ref, cos_ref, sin_ref, o_ref, *, num, din):
    x = proj_ref[0]                                      # (Q, num*2*din)
    cos0, sin0 = cos_ref[0], sin_ref[0]                  # (Q, din)
    cos_slab = jnp.concatenate([cos0] * (2 * num), axis=1)
    sin_slab = jnp.concatenate([sin0] * (2 * num), axis=1)
    xr = _rope_slab(x, cos_slab, sin_slab)
    for h in range(num):
        base = 2 * din * h
        q_r = xr[:, base:base + din].astype(_BF16)
        k_r = xr[:, base + din:base + 2 * din].astype(_BF16)
        # [k_index, q_index] orientation — matches the reference (see header).
        o_ref[0, h] = lax.dot_general(k_r, q_r, (((1,), (1,)), ((), ())),
                                      preferred_element_type=_F32)


def ent_head(proj, cos0, sin0, *, num, din):
    B, Q, O = proj.shape
    return pl.pallas_call(
        functools.partial(_ent_heads_kernel, num=num, din=din),
        out_shape=jax.ShapeDtypeStruct((B, num, Q, Q), _F32),
        grid=(B,),
        in_specs=[
            pl.BlockSpec((1, Q, O), lambda b: (b, 0, 0)),
            pl.BlockSpec((1, Q, din), lambda b: (0, 0, 0)),   # shared table: resident
            pl.BlockSpec((1, Q, din), lambda b: (0, 0, 0)),
        ],
        out_specs=pl.BlockSpec((1, num, Q, Q), lambda b: (b, 0, 0, 0)),
        compiler_params=pltpu.CompilerParams(
            dimension_semantics=("parallel",),
            vmem_limit_bytes=32 * 1024 * 1024),
    )(proj, cos0, sin0)


# -----------------------------------------------------------------------------
# Kernel 3 ('rel', fused): per-batch, all 5 heads:
#   bi   = rot_tok(k_tok) @ rot_tok(q_tok)^T                (= "rate")
#   lg1  = rot_utt(k_utt) @ rot_utt(q_utt)^T
#   tri[z,x,y] = sum_{i,k,j} x1_aug[x,i] W[i,k,j] q3[z,k] q2[y,j]   (Triaffine)
#   out[z,y] = sum_x softmax_x(tri)*(rate[z,x]+rate[x,y]) + rate[z,y] + lg1[z,y]
#
# Triaffine build per z-block (tri stored [x, z, y] so reductions over x are
# over the leading dim and all reshapes keep the lane dim unchanged):
#   xw[x,(k,j)] = tx @ W_flat + bias_row                (1 MXU matmul / head)
#   m2[x,z,j]   = sum_k xw[x,(k,j)] * tz[z,k]           (dsub VPU MAC steps)
#   tri[x,z,y]  = (m2 as (Q*zblk, dsub)) @ ty^T         (1 big MXU matmul / block)
# No (Q,Q,Q) cube and no G scratch ever live in VMEM.
# -----------------------------------------------------------------------------
def _rel_fused_kernel(proj_ref, proj1_ref, cos0_ref, sin0_ref, cos1_ref, sin1_ref,
                      wm_ref, wb_ref, o_ref, bi_scr, lg1_scr,
                      *, num, din, dsub, q_len, zblk, soft):
    Q = q_len
    x = proj_ref[0]                        # (Q, num*4*din)   [qt|qu|kt|ku] per head
    x1 = proj1_ref[0]                      # (Q, num*3*dsub)  [q1|q2|q3]    per head
    cos0, sin0 = cos0_ref[0], sin0_ref[0]  # token table (shared)
    cos1, sin1 = cos1_ref[0], sin1_ref[0]  # utterance table (per batch)
    wm = wm_ref[...]                       # bf16 (dsub, dsub*dsub)  W[i, k*dsub+j]
    wb = wb_ref[...]                       # f32  (1, dsub*dsub)     bias_x row

    # RoPE on the whole slab in one shot: cos/sin tiled [tok|utt|tok|utt] per head.
    cos_slab = jnp.concatenate([cos0, cos1, cos0, cos1] * num, axis=1)
    sin_slab = jnp.concatenate([sin0, sin1, sin0, sin1] * num, axis=1)
    xr = _rope_slab(x, cos_slab, sin_slab)

    nblk = Q // zblk

    for h in range(num):
        b4 = 4 * din * h
        qt = xr[:, b4:b4 + din].astype(_BF16)
        qu = xr[:, b4 + din:b4 + 2 * din].astype(_BF16)
        kt = xr[:, b4 + 2 * din:b4 + 3 * din].astype(_BF16)
        ku = xr[:, b4 + 3 * din:b4 + 4 * din].astype(_BF16)

        bi = lax.dot_general(kt, qt, (((1,), (1,)), ((), ())),   # token bilinear / rate
                             preferred_element_type=_F32)
        lg1 = lax.dot_general(ku, qu, (((1,), (1,)), ((), ())),  # utterance bilinear
                              preferred_element_type=_F32)
        bi_scr[...] = bi
        lg1_scr[...] = lg1
        bi_x1y = bi[:, None, :]            # hoisted broadcast: rate[x, y]

        b3 = 3 * dsub * h
        tx = x1[:, b3:b3 + dsub]                    # Triaffine x (contracts i)
        ty = x1[:, b3 + dsub:b3 + 2 * dsub]         # Triaffine y (contracts j)
        ty_b = ty.astype(_BF16)
        # xw[x, k*dsub+j] = sum_i tx[x,i] W[i,k,j] + W[bias,k,j]
        xw = jnp.dot(tx.astype(_BF16), wm, preferred_element_type=_F32) + wb

        def z_block(blk, carry):
            zs = pl.multiple_of(blk * zblk, zblk)
            tz = proj1_ref[0, pl.ds(zs, zblk), b3 + 2 * dsub:b3 + 3 * dsub]  # (zblk,dsub)

            # m2[x, z, j] = sum_k xw[x, k*dsub+j] * tz[z, k]   (dsub VPU MAC steps)
            m2 = xw[:, 0:dsub][:, None, :] * tz[:, 0:1][None, :, :]
            for k in range(1, dsub):
                m2 = m2 + (xw[:, k * dsub:(k + 1) * dsub][:, None, :]
                           * tz[:, k:k + 1][None, :, :])

            # tri[z,x,y] (stored [x,z,y]) = sum_j m2[x,z,j] * ty[y,j]  (1 MXU matmul)
            t2 = lax.dot_general(m2.reshape(Q * zblk, dsub).astype(_BF16), ty_b,
                                 (((1,), (1,)), ((), ())),
                                 preferred_element_type=_F32)      # (Q*zblk, Q)
            t3 = t2.reshape(Q, zblk, Q)                            # [x, z, y]

            rate_zq = bi_scr[pl.ds(zs, zblk), :]     # rate[z, .]   (zblk, Q)
            lg1_blk = lg1_scr[pl.ds(zs, zblk), :]    # lg1[z, y]
            rate_xz = jnp.transpose(rate_zq)         # rate[z, x] viewed [x, z]
            w_xy = rate_xz[:, :, None] + bi_x1y      # rate[z,x] + rate[x,y]

            if soft:
                mx = jnp.max(t3, axis=0, keepdims=True)
                e = jnp.exp(t3 - mx)
                den = jnp.sum(e, axis=0)                           # (zblk, Q)
                ksum = jnp.sum(e * w_xy, axis=0)                   # K1 + K2 (unnormed)
                out_blk = (ksum * pl.reciprocal(den, approx=True)
                           + rate_zq + lg1_blk)
            else:
                out_blk = jnp.sum(t3 * w_xy, axis=0) + rate_zq + lg1_blk

            o_ref[0, h, pl.ds(zs, zblk), :] = out_blk
            return carry

        lax.fori_loop(0, nblk, z_block, 0)


def _pick_zblk(q_len, budget_bytes=8 << 20):
    """z-tile: multiple of 8 dividing Q, sized so one (Q, zblk, Q) f32 tri block
    stays within budget (v7x 64 MiB VMEM safe). Falls back to Q when Q % 8 != 0
    (non-8-aligned sequence lengths may hit slower in-kernel relayouts)."""
    if q_len % 8 != 0 or q_len <= 8:
        return q_len
    cap = max(8, min(q_len, (budget_bytes // (4 * q_len * q_len)) // 8 * 8))
    zb, d = 8, 8
    while d <= cap:
        if q_len % d == 0:
            zb = d
        d += 8
    return zb


def rel_head(proj, proj1, cos0, sin0, cos1, sin1, tri_w, *, num, din, dsub, soft):
    B, Q, O = proj.shape
    O1 = proj1.shape[-1]
    wm = tri_w[:dsub].reshape(dsub, dsub * dsub).astype(_BF16)   # W[i, k*dsub+j]
    wb = tri_w[dsub].reshape(1, dsub * dsub).astype(_F32)        # bias_x row
    zblk = _pick_zblk(Q)
    return pl.pallas_call(
        functools.partial(_rel_fused_kernel, num=num, din=din, dsub=dsub,
                          q_len=Q, zblk=zblk, soft=soft),
        out_shape=jax.ShapeDtypeStruct((B, num, Q, Q), _F32),
        grid=(B,),
        in_specs=[
            pl.BlockSpec((1, Q, O), lambda b: (b, 0, 0)),
            pl.BlockSpec((1, Q, O1), lambda b: (b, 0, 0)),
            pl.BlockSpec((1, Q, din), lambda b: (0, 0, 0)),  # token table: resident
            pl.BlockSpec((1, Q, din), lambda b: (0, 0, 0)),
            pl.BlockSpec((1, Q, din), lambda b: (b, 0, 0)),  # utterance table: per batch
            pl.BlockSpec((1, Q, din), lambda b: (b, 0, 0)),
            pl.BlockSpec((dsub, dsub * dsub), lambda b: (0, 0)),
            pl.BlockSpec((1, dsub * dsub), lambda b: (0, 0)),
        ],
        out_specs=pl.BlockSpec((1, num, Q, Q), lambda b: (b, 0, 0, 0)),
        scratch_shapes=[pltpu.VMEM((Q, Q), _F32),    # bi  ("rate")
                        pltpu.VMEM((Q, Q), _F32)],   # lg1
        compiler_params=pltpu.CompilerParams(
            dimension_semantics=("parallel",),
            vmem_limit_bytes=56 * 1024 * 1024),      # > v5e/v6e 16/32 MiB defaults, < v7x 64
    )(proj, proj1, cos0, sin0, cos1, sin1, wm, wb)


# -----------------------------------------------------------------------------
# Kernel 4: masked, class-weighted cross-entropy on class-major logits.
#   Accumulates numerator / denominator over the batch grid; divide outside.
# -----------------------------------------------------------------------------
def _ce_kernel(logits_ref, labels_ref, mask_ref, num_ref, den_ref, *, n_cls, weights):
    @pl.when(pl.program_id(0) == 0)
    def _():
        num_ref[...] = jnp.zeros_like(num_ref)
        den_ref[...] = jnp.zeros_like(den_ref)

    lg = logits_ref[0]                        # (n_cls, Q, Q) f32
    lbl = labels_ref[0]                       # (Q, Q) int32
    msk = (mask_ref[0] == 1).astype(_F32)     # (Q, Q)

    m = lg[0]
    for c in range(1, n_cls):
        m = jnp.maximum(m, lg[c])
    s = jnp.zeros_like(m)
    for c in range(n_cls):
        s = s + jnp.exp(lg[c] - m)
    lse = m + jnp.log(s)

    chosen = jnp.zeros_like(m)
    wsel = jnp.zeros_like(m)
    for c in range(n_cls):
        hit = (lbl == c).astype(_F32)
        chosen = chosen + hit * lg[c]
        wsel = wsel + hit * weights[c]
    wsel = wsel * msk

    num_ref[...] += jnp.sum(jnp.sum(wsel * (lse - chosen), axis=0, keepdims=True),
                            axis=1, keepdims=True)
    den_ref[...] += jnp.sum(jnp.sum(wsel, axis=0, keepdims=True),
                            axis=1, keepdims=True)


def ce_loss(logits_cm, labels, mask, weights):
    B, C, Q, _ = logits_cm.shape
    num_s, den_s = pl.pallas_call(
        functools.partial(_ce_kernel, n_cls=C,
                          weights=tuple(float(w) for w in weights)),
        out_shape=(jax.ShapeDtypeStruct((1, 1), _F32),
                   jax.ShapeDtypeStruct((1, 1), _F32)),
        grid=(B,),
        in_specs=[
            pl.BlockSpec((1, C, Q, Q), lambda b: (b, 0, 0, 0)),
            pl.BlockSpec((1, Q, Q), lambda b: (b, 0, 0)),
            pl.BlockSpec((1, Q, Q), lambda b: (b, 0, 0)),
        ],
        out_specs=(pl.BlockSpec((1, 1), lambda b: (0, 0)),
                   pl.BlockSpec((1, 1), lambda b: (0, 0))),
        compiler_params=_ARB1,
    )(logits_cm, labels.astype(jnp.int32), mask.astype(jnp.int32))
    # Matches nn.CrossEntropyLoss(weight) semantics (NaN if no active cells).
    return num_s[0, 0] / den_s[0, 0]


# -----------------------------------------------------------------------------
# Plain-JAX glue: RoPE cos/sin tables.
# -----------------------------------------------------------------------------
def sinusoidal_cos_sin(positions, dim, base):
    """custom_sinusoidal_position_embedding + repeat_interleave(2) slicing."""
    idx = jnp.arange(dim // 2, dtype=_F32)
    inv = jnp.power(jnp.float32(base), -2.0 * idx / dim)
    ang = positions.astype(_F32)[..., None] * inv          # (..., Q, dim//2)
    cos = jnp.repeat(jnp.cos(ang), 2, axis=-1)
    sin = jnp.repeat(jnp.sin(ang), 2, axis=-1)
    return cos, sin


# -----------------------------------------------------------------------------
# Forward pass of BertWordPair (post BERT/HAN/fusion).
# -----------------------------------------------------------------------------
def bert_word_pair_forward(params, cfg, kwargs):
    seq = kwargs["sequence_outputs"]                 # (B, Q, H)
    token2sents = kwargs["token2sents"]              # (B, Q)
    B, Q, H = seq.shape
    din = cfg["inner_dim"]
    dsub = cfg["inner_dim_sub"]
    soft = cfg["soft"] == "soft"

    seq2d = seq.reshape(B * Q, H)
    proj_ent, proj_rel, proj_rel1 = fused_projections(
        seq2d,
        params["ent_w"], params["ent_b"],
        params["rel_w"], params["rel_b"],
        params["rel1_w"], params["rel1_b"])
    proj_ent = proj_ent.reshape(B, Q, -1)
    proj_rel = proj_rel.reshape(B, Q, -1)
    proj_rel1 = proj_rel1.reshape(B, Q, -1)

    cos0, sin0 = sinusoidal_cos_sin(jnp.arange(Q, dtype=_F32), din, 10000.0)
    cos0, sin0 = cos0[None], sin0[None]              # (1, Q, din) shared token table
    cos1, sin1 = sinusoidal_cos_sin(token2sents, din, 15.0)   # (B, Q, din)

    losses, tags = [], []

    # ---------------- 'ent' head (4 classes) ----------------
    ent_cm = ent_head(proj_ent, cos0, sin0, num=4, din=din)          # (B,4,Q,Q)
    w_ent = (1.0,) + (float(cfg["loss_weight"]["ent"]),) * 3
    losses.append(ce_loss(ent_cm, kwargs["ent_matrix"], kwargs["sentence_masks"], w_ent))
    # channel-last per the module contract (pure layout; keep class-major if the
    # downstream consumer allows — see review note).
    tags.append(jnp.transpose(ent_cm, (0, 2, 3, 1)))

    # ---------------- 'rel' head (5 classes) ----------------
    rel_cm = rel_head(proj_rel, proj_rel1, cos0, sin0, cos1, sin1,
                      params["tri_w"], num=5, din=din, dsub=dsub, soft=soft)
    w_rel = (1.0,) + (float(cfg["loss_weight"]["rel"]),) * 4
    losses.append(ce_loss(rel_cm, kwargs["rel_matrix"], kwargs["full_masks"], w_rel))
    tags.append(jnp.transpose(rel_cm, (0, 2, 3, 1)))

    return losses, tags


# -----------------------------------------------------------------------------
# Deterministic parameter init + example inputs
# -----------------------------------------------------------------------------
if __name__ == "__main__":
    B, Q, H = 2, 8, 32
    cfg = dict(inner_dim=32, inner_dim_sub=16, soft="soft",
               loss_weight={"ent": 2.0, "rel": 2.0})
    din, dsub = cfg["inner_dim"], cfg["inner_dim_sub"]

    keys = jax.random.split(jax.random.PRNGKey(0), 10)
    params = {
        "ent_w": 0.02 * jax.random.normal(keys[0], (H, din * 2 * 4), _F32),
        "ent_b": jnp.zeros((din * 2 * 4,), _F32),
        "rel_w": 0.02 * jax.random.normal(keys[1], (H, din * 4 * 5), _F32),
        "rel_b": jnp.zeros((din * 4 * 5,), _F32),
        "rel1_w": 0.02 * jax.random.normal(keys[2], (H, dsub * 3 * 5), _F32),
        "rel1_b": jnp.zeros((dsub * 3 * 5,), _F32),
        # Triaffine weight (n_out=1, bias_x=True, bias_y=False): (dsub+1, dsub, dsub)
        "tri_w": 0.05 * jax.random.normal(keys[3], (dsub + 1, dsub, dsub), _F32),
    }

    token2sents = jnp.array([[0, 0, 0, 1, 1, 1, 2, 2],
                             [0, 0, 1, 1, 2, 2, 2, 3]], jnp.int32)
    sentence_masks = jax.random.bernoulli(keys[7], 0.7, (B, Q, Q)).astype(jnp.int32)
    sentence_masks = sentence_masks.at[0, 0, 0].set(1)
    full_masks = jax.random.bernoulli(keys[8], 0.8, (B, Q, Q)).astype(jnp.int32)
    full_masks = full_masks.at[0, 0, 0].set(1)

    kwargs = {
        # stand-in for BERT + HAN + FusionGate hidden states (see TODO above)
        "sequence_outputs": jax.random.normal(keys[4], (B, Q, H), _F32),
        "token_index": jnp.broadcast_to(jnp.arange(Q, dtype=jnp.int32), (B, Q)),
        "utterance_index": token2sents,
        "token2sents": token2sents,
        "ent_matrix": jax.random.randint(keys[5], (B, Q, Q), 0, 4, jnp.int32),
        "rel_matrix": jax.random.randint(keys[6], (B, Q, Q), 0, 5, jnp.int32),
        "sentence_masks": sentence_masks,
        "full_masks": full_masks,
    }

    losses, tags = bert_word_pair_forward(params, cfg, kwargs)
    jax.block_until_ready((losses, tags))

    assert tags[0].shape == (B, Q, Q, 4)
    assert tags[1].shape == (B, Q, Q, 5)
    assert bool(jnp.isfinite(losses[0])) and bool(jnp.isfinite(losses[1]))
    print("KERNEL_OK")
</pallas_src>

<mosaic_0001>
module attributes {stable_mosaic.version = 11 : i64} {
  func.func @_proj3_kernel(%arg0: i32, %arg1: memref<16x32xf32, #tpu.memory_space<vmem>>, %arg2: memref<32x256xbf16, #tpu.memory_space<vmem>>, %arg3: memref<1x256xf32, #tpu.memory_space<vmem>>, %arg4: memref<32x640xbf16, #tpu.memory_space<vmem>>, %arg5: memref<1x640xf32, #tpu.memory_space<vmem>>, %arg6: memref<32x240xbf16, #tpu.memory_space<vmem>>, %arg7: memref<1x240xf32, #tpu.memory_space<vmem>>, %arg8: memref<16x256xf32, #tpu.memory_space<vmem>>, %arg9: memref<16x640xf32, #tpu.memory_space<vmem>>, %arg10: memref<16x240xf32, #tpu.memory_space<vmem>>) attributes {dimension_semantics = [#tpu.dimension_semantics<parallel>], iteration_bounds = array<i64: 1>, scalar_prefetch = 0 : i64, scratch_operands = 0 : i64, tpu.core_type = #tpu.core_type<tc>, window_params = [{transform_indices = @transform_0, window_bounds = array<i64: 16, 32>}, {pipeline_mode = #tpu.pipeline_mode<synchronous>, transform_indices = @transform_1, window_bounds = array<i64: 32, 256>}, {pipeline_mode = #tpu.pipeline_mode<synchronous>, transform_indices = @transform_2, window_bounds = array<i64: 1, 256>}, {pipeline_mode = #tpu.pipeline_mode<synchronous>, transform_indices = @transform_3, window_bounds = array<i64: 32, 640>}, {pipeline_mode = #tpu.pipeline_mode<synchronous>, transform_indices = @transform_4, window_bounds = array<i64: 1, 640>}, {pipeline_mode = #tpu.pipeline_mode<synchronous>, transform_indices = @transform_5, window_bounds = array<i64: 32, 240>}, {pipeline_mode = #tpu.pipeline_mode<synchronous>, transform_indices = @transform_6, window_bounds = array<i64: 1, 240>}, {transform_indices = @transform_7, window_bounds = array<i64: 16, 256>}, {transform_indices = @transform_8, window_bounds = array<i64: 16, 640>}, {transform_indices = @transform_9, window_bounds = array<i64: 16, 240>}]} {
    %c0 = arith.constant 0 : index
    %c0_0 = arith.constant 0 : index
    %0 = vector.load %arg1[%c0, %c0_0] : memref<16x32xf32, #tpu.memory_space<vmem>>, vector<16x32xf32>
    %1 = arith.truncf %0 : vector<16x32xf32> to vector<16x32xbf16>
    %c0_1 = arith.constant 0 : index
    %c0_2 = arith.constant 0 : index
    %2 = vector.load %arg2[%c0_1, %c0_2] : memref<32x256xbf16, #tpu.memory_space<vmem>>, vector<32x256xbf16>
    %cst = arith.constant dense<0.000000e+00> : vector<16x256xf32>
    %3 = tpu.matmul %1, %2, %cst {dimension_numbers = #tpu.dot_dimension_numbers<[1], [0], [0], [1], [0, 0, 1, 1], [], []>} : vector<16x32xbf16>, vector<32x256xbf16>, vector<16x256xf32> -> vector<16x256xf32>
    %c0_3 = arith.constant 0 : index
    %c0_4 = arith.constant 0 : index
    %4 = vector.load %arg3[%c0_3, %c0_4] : memref<1x256xf32, #tpu.memory_space<vmem>>, vector<1x256xf32>
    %5 = vector.broadcast %4 : vector<1x256xf32> to vector<16x256xf32>
    %6 = arith.addf %3, %5 : vector<16x256xf32>
    %c0_5 = arith.constant 0 : index
    %c0_6 = arith.constant 0 : index
    %7 = vector.load %arg8[%c0_5, %c0_6] : memref<16x256xf32, #tpu.memory_space<vmem>>, vector<16x256xf32>
    tpu.vector_store %arg8[%c0_5, %c0_6], %6 {strides = array<i32>} : memref<16x256xf32, #tpu.memory_space<vmem>>, vector<16x256xf32>,
    %c0_7 = arith.constant 0 : index
    %c0_8 = arith.constant 0 : index
    %8 = vector.load %arg4[%c0_7, %c0_8] : memref<32x640xbf16, #tpu.memory_space<vmem>>, vector<32x640xbf16>
    %cst_9 = arith.constant dense<0.000000e+00> : vector<16x640xf32>
    %9 = tpu.matmul %1, %8, %cst_9 {dimension_numbers = #tpu.dot_dimension_numbers<[1], [0], [0], [1], [0, 0, 1, 1], [], []>} : vector<16x32xbf16>, vector<32x640xbf16>, vector<16x640xf32> -> vector<16x640xf32>
    %c0_10 = arith.constant 0 : index
    %c0_11 = arith.constant 0 : index
    %10 = vector.load %arg5[%c0_10, %c0_11] : memref<1x640xf32, #tpu.memory_space<vmem>>, vector<1x640xf32>
    %11 = vector.broadcast %10 : vector<1x640xf32> to vector<16x640xf32>
    %12 = arith.addf %9, %11 : vector<16x640xf32>
    %c0_12 = arith.constant 0 : index
    %c0_13 = arith.constant 0 : index
    %13 = vector.load %arg9[%c0_12, %c0_13] : memref<16x640xf32, #tpu.memory_space<vmem>>, vector<16x640xf32>
    tpu.vector_store %arg9[%c0_12, %c0_13], %12 {strides = array<i32>} : memref<16x640xf32, #tpu.memory_space<vmem>>, vector<16x640xf32>,
    %c0_14 = arith.constant 0 : index
    %c0_15 = arith.constant 0 : index
    %14 = vector.load %arg6[%c0_14, %c0_15] : memref<32x240xbf16, #tpu.memory_space<vmem>>, vector<32x240xbf16>
    %cst_16 = arith.constant dense<0.000000e+00> : vector<16x240xf32>
    %15 = tpu.matmul %1, %14, %cst_16 {dimension_numbers = #tpu.dot_dimension_numbers<[1], [0], [0], [1], [0, 0, 1, 1], [], []>} : vector<16x32xbf16>, vector<32x240xbf16>, vector<16x240xf32> -> vector<16x240xf32>
    %c0_17 = arith.constant 0 : index
    %c0_18 = arith.constant 0 : index
    %16 = vector.load %arg7[%c0_17, %c0_18] : memref<1x240xf32, #tpu.memory_space<vmem>>, vector<1x240xf32>
    %17 = vector.broadcast %16 : vector<1x240xf32> to vector<16x240xf32>
    %18 = arith.addf %15, %17 : vector<16x240xf32>
    %c0_19 = arith.constant 0 : index
    %c0_20 = arith.constant 0 : index
    %19 = vector.load %arg10[%c0_19, %c0_20] : memref<16x240xf32, #tpu.memory_space<vmem>>, vector<16x240xf32>
    tpu.vector_store %arg10[%c0_19, %c0_20], %18 {strides = array<i32>} : memref<16x240xf32, #tpu.memory_space<vmem>>, vector<16x240xf32>,
    return
  }
  func.func @transform_0(%arg0: i32) -> (i32, i32) {
    %c0_i32 = arith.constant 0 : i32
    %c0_i32_0 = arith.constant 0 : i32
    return %arg0, %c0_i32 : i32, i32
  }
  func.func @transform_1(%arg0: i32) -> (i32, i32) {
    %c0_i32 = arith.constant 0 : i32
    %c0_i32_0 = arith.constant 0 : i32
    %c0_i32_1 = arith.constant 0 : i32
    return %c0_i32, %c0_i32_0 : i32, i32
  }
  func.func @transform_2(%arg0: i32) -> (i32, i32) {
    %c0_i32 = arith.constant 0 : i32
    %c0_i32_0 = arith.constant 0 : i32
    %c0_i32_1 = arith.constant 0 : i32
    return %c0_i32, %c0_i32_0 : i32, i32
  }
  func.func @transform_3(%arg0: i32) -> (i32, i32) {
    %c0_i32 = arith.constant 0 : i32
    %c0_i32_0 = arith.constant 0 : i32
    %c0_i32_1 = arith.constant 0 : i32
    return %c0_i32, %c0_i32_0 : i32, i32
  }
  func.func @transform_4(%arg0: i32) -> (i32, i32) {
    %c0_i32 = arith.constant 0 : i32
    %c0_i32_0 = arith.constant 0 : i32
    %c0_i32_1 = arith.constant 0 : i32
    return %c0_i32, %c0_i32_0 : i32, i32
  }
  func.func @transform_5(%arg0: i32) -> (i32, i32) {
    %c0_i32 = arith.constant 0 : i32
    %c0_i32_0 = arith.constant 0 : i32
    %c0_i32_1 = arith.constant 0 : i32
    return %c0_i32, %c0_i32_0 : i32, i32
  }
  func.func @transform_6(%arg0: i32) -> (i32, i32) {
    %c0_i32 = arith.constant 0 : i32
    %c0_i32_0 = arith.constant 0 : i32
    %c0_i32_1 = arith.constant 0 : i32
    return %c0_i32, %c0_i32_0 : i32, i32
  }
  func.func @transform_7(%arg0: i32) -> (i32, i32) {
    %c0_i32 = arith.constant 0 : i32
    %c0_i32_0 = arith.constant 0 : i32
    return %arg0, %c0_i32 : i32, i32
  }
  func.func @transform_8(%arg0: i32) -> (i32, i32) {
    %c0_i32 = arith.constant 0 : i32
    %c0_i32_0 = arith.constant 0 : i32
    return %arg0, %c0_i32 : i32, i32
  }
  func.func @transform_9(%arg0: i32) -> (i32, i32) {
    %c0_i32 = arith.constant 0 : i32
    %c0_i32_0 = arith.constant 0 : i32
    return %arg0, %c0_i32 : i32, i32
  }
}

</mosaic_0001>

<bundles_post_ra>
// kernel: tpu_custom_call.1
= control target key start
LH: loop header
LB: loop body
LE: loop exit
PB: predicated region body
PF: predicated region fallthrough
CT: control target
= control target key end

     0   :  { %15 = vsyncpa [#allocation3], 0  ;;  %s995_s0 = inlined_call_operand.hbm [shape: f32[16,32], index: 0, kind: input, shape index: {}]   ;;  %s996_s1 = inlined_call_operand.hbm [shape: bf16[32,256], index: 1, kind: input, shape index: {}]   ;;  %s997_s2 = inlined_call_operand.vmem [shape: f32[1,256], index: 2, kind: input, shape index: {}]   ;;  %s998_s3 = inlined_call_operand.hbm [shape: bf16[32,640], index: 3, kind: input, shape index: {}]   ;;  %s999_s4 = inlined_call_operand.vmem [shape: f32[1,640], index: 4, kind: input, shape index: {}]   ;;  %s1000_s5 = inlined_call_operand.hbm [shape: bf16[32,240], index: 5, kind: input, shape index: {}]   ;;  %s1001_s6 = inlined_call_operand.vmem [shape: f32[1,240], index: 6, kind: input, shape index: {}]   ;;  %s1002_s7 = inlined_call_operand.hbm [shape: f32[16,256], index: 7, kind: output, shape index: {0}]   ;;  %s1003_s8 = inlined_call_operand.hbm [shape: f32[16,640], index: 8, kind: output, shape index: {1}]   ;;  %s1004_s9 = inlined_call_operand.hbm [shape: f32[16,240], index: 9, kind: output, shape index: {2}]  }
   0x1   :  { %16 = vsyncpa [#allocation6], 0 }
   0x2   :  { %17 = vsyncpa [#allocation9], 0 }
   0x3   :  { %18 = vsyncpa [#allocation4], 0 }
   0x4   :  { %19 = vsyncpa [#allocation12], 0  ;;  %s781_s30 = smov [#allocation5]   ;;  %s782_s11 = smov [#allocation2]  }
   0x5   :  { %s37_s10 = sshll.u32 %s781_s30, 4  ;;  %s25_s12 = sshll.u32 %s782_s11, 4  ;;  %s38_s10 = int_to_ptr.vmem [resolvable:$true] %s37_s10  ;;  %s849_s12 = int_to_ptr.vmem [resolvable:$true] %s25_s12 }
   0x6   :  { %s617_s15 = scalar_lea.hbm %s996_s1, 512 }
   0x7   :  { %p618_p0 = scmp.ne.s32.totalorder %s996_s1, %s617_s15  ;;  %p621_p1 = scmp.lt.u32.totalorder %s617_s15, %s996_s1 }
   0x9   :  { %p623_p2 = pnand %p621_p1, %p618_p0 }
   0xb   :  { %626 = shalt.err (!%p623_p2)
}
   0xc   :  { %s627_s20 = scalar_lea.vmem %s38_s10, 512  ;;  %p632_p4 = scmp.lt.s32.totalorder %s38_s10, %s38_s10 }
   0xd   :  { %p628_p3 = scmp.ne.s32.totalorder %s38_s10, %s627_s20  ;;  %p633_p5 = scmp.lt.s32.totalorder %s627_s20, %s627_s20 }
   0xf   :  { %p634_p6 = por %p633_p5, %p632_p4 }
  0x11   :  { %p635_p7 = pnand %p634_p6, %p628_p3 }
  0x13   :  { %638 = shalt.err (!%p635_p7)
}
  0x14   :  { %s783_s21 = smov 128   ;;  %s784_s22 = smov 8  }
  0x15   :  { %43 = dma.hbm_to_vmem [thread:$0]  %s996_s1, 512, %s38_s10, [#allocation6], %s783_s21, %s783_s21, %s784_s22  }
  0x16   :  { %s639_s27 = scalar_lea.hbm %s995_s0, 256 }
  0x17   :  { %p640_p8 = scmp.ne.s32.totalorder %s995_s0, %s639_s27  ;;  %p643_p9 = scmp.lt.u32.totalorder %s639_s27, %s995_s0 }
  0x19   :  { %p645_p10 = pnand %p643_p9, %p640_p8 }
  0x1b   :  { %648 = shalt.err (!%p645_p10)
}
  0x1c   :  { %s649_s13 = scalar_lea.vmem %s849_s12, 256  ;;  %p654_p12 = scmp.lt.s32.totalorder %s849_s12, %s849_s12 }
  0x1d   :  { %p650_p11 = scmp.ne.s32.totalorder %s849_s12, %s649_s13  ;;  %p655_p13 = scmp.lt.s32.totalorder %s649_s13, %s649_s13 }
  0x1f   :  { %p656_p0 = por %p655_p13, %p654_p12 }
  0x21   :  { %p657_p1 = pnand %p656_p0, %p650_p11 }
  0x23   :  { %660 = shalt.err (!%p657_p1)
}
  0x24   :  { %31 = dma.hbm_to_vmem [thread:$0]  %s995_s0, 256, %s849_s12, [#allocation3], %s783_s21, %s783_s21, %s784_s22  }
  0x25   :  { %s785_s14 = smov [#allocation7]   ;;  %s661_s18 = scalar_lea.hbm %s998_s3, 1280 }
  0x26   :  { %s51_s15 = sshll.u32 %s785_s14, 4  ;;  %p662_p2 = scmp.ne.s32.totalorder %s998_s3, %s661_s18  ;;  %s52_s15 = int_to_ptr.vmem [resolvable:$true] %s51_s15 }
  0x27   :  { %p665_p3 = scmp.lt.u32.totalorder %s661_s18, %s998_s3 }
  0x29   :  { %p667_p4 = pnand %p665_p3, %p662_p2 }
  0x2b   :  { %670 = shalt.err (!%p667_p4)
}
  0x2c   :  { %s671_s25 = scalar_lea.vmem %s52_s15, 1280  ;;  %p676_p6 = scmp.lt.s32.totalorder %s52_s15, %s52_s15 }
  0x2d   :  { %p672_p5 = scmp.ne.s32.totalorder %s52_s15, %s671_s25  ;;  %p677_p7 = scmp.lt.s32.totalorder %s671_s25, %s671_s25 }
  0x2f   :  { %p678_p8 = por %p677_p7, %p676_p6 }
  0x31   :  { %p679_p9 = pnand %p678_p8, %p672_p5 }
  0x33   :  { %682 = shalt.err (!%p679_p9)
}
  0x34   :  { %s786_s0 = smov 320   ;;  %s787_s12 = smov 20  }
  0x35   :  { %57 = dma.hbm_to_vmem [thread:$0]  %s998_s3, 1280, %s52_s15, [#allocation6], %s786_s0, %s786_s0, %s787_s12  }
  0x36   :  { %s788_s28 = smov [#allocation8]   ;;  %s683_s13 = scalar_lea.hbm %s1000_s5, 512 }
  0x37   :  { %s65_s29 = sshll.u32 %s788_s28, 4  ;;  %p684_p10 = scmp.ne.s32.totalorder %s1000_s5, %s683_s13  ;;  %s66_s29 = int_to_ptr.vmem [resolvable:$true] %s65_s29 }
  0x38   :  { %p687_p11 = scmp.lt.u32.totalorder %s683_s13, %s1000_s5 }
  0x3a   :  { %p689_p12 = pnand %p687_p11, %p684_p10 }
  0x3c   :  { %692 = shalt.err (!%p689_p12)
}
  0x3d   :  { %s693_s17 = scalar_lea.vmem %s66_s29, 512  ;;  %p698_p0 = scmp.lt.s32.totalorder %s66_s29, %s66_s29 }
  0x3e   :  { %p694_p13 = scmp.ne.s32.totalorder %s66_s29, %s693_s17  ;;  %p699_p1 = scmp.lt.s32.totalorder %s693_s17, %s693_s17 }
  0x40   :  { %p700_p2 = por %p699_p1, %p698_p0 }
  0x42   :  { %p701_p3 = pnand %p700_p2, %p694_p13 }
  0x44   :  { %704 = shalt.err (!%p701_p3)
}
  0x45   :  { %71 = dma.hbm_to_vmem [thread:$0]  %s1000_s5, 512, %s66_s29, [#allocation9], %s783_s21, %s783_s21, %s784_s22  }
  0x46   :  { %771 = dma.done.wait [#allocation3], 256  }
  0x47   :  { %772 = vsyncadd [#allocation3], 4294967040 }
  0x48   :  { %773 = dma.done.wait [#allocation6], 1792  }
  0x49   :  { %774 = vsyncadd [#allocation6], 4294965504 }
  0x4a   :  { %775 = dma.done.wait [#allocation9], 512  }
  0x4b   :  { %776 = vsyncadd [#allocation9], 4294966784  ;;  %v789_v0 = vmov 0   ;;  %v591_v1 = vld [vmem:[#allocation5 + $0x4] ss:$8 sps:$4 sm:$0xff]   ;;  %v87_v7 = vld [vmem:[#allocation2] sm:$0xff]  ;;  %v96_v23 = vlaneseq }
  0x4c   :  { %162 = vmatprep.mubr.bf16.mxu0 %v789_v0  ;;  %300 = vmatprep.mubr.bf16.mxu1 %v789_v0  ;;  %v593_v2 = vld [vmem:[#allocation5] ss:$8 sps:$4 sm:$0xff]   ;;  %v594_v3 = vld [vmem:[#allocation5 + $0x14] ss:$8 sps:$4 sm:$0xff]   ;;  %v596_v4 = vld [vmem:[#allocation5 + $0x10] ss:$8 sps:$4 sm:$0xff]  }
  0x4d   :  { %130 = vmatprep.subr.bf16.mxu0 %v591_v1  ;;  %v597_v5 = vld [vmem:[#allocation7 + $0x4] ss:$20 sps:$4 sm:$0xff]   ;;  %v599_v6 = vld [vmem:[#allocation7] ss:$20 sps:$4 sm:$0xff]   ;;  %v600_v9 = vld [vmem:[#allocation7 + $0x8] ss:$20 sps:$4 sm:$0xff]  }
  0x4e   :  { %131 = vmatpush1.bf16.msra.mxu0 %v593_v2  ;;  %v88_v8 = vld [vmem:[#allocation2 + $0x8] sm:$0xff]  ;;  %268 = vmatprep.subr.bf16.mxu1 %v597_v5  ;;  %v602_v10 = vld [vmem:[#allocation7 + $0xc] ss:$20 sps:$4 sm:$0xff]   ;;  %vm126_vm0 = vcmask 261120   ;;  %v608_v14 = vld [vmem:[#allocation7 + $0x34] ss:$20 sps:$4 sm:$0xff]  }
  0x4f   :  { %132 = vmatprep.subr.bf16.mxu0 %v594_v3  ;;  %269 = vmatpush1.bf16.msra.mxu1 %v599_v6  ;;  %v89_v11 = vpack.c.bf16 %v88_v8, %v87_v7  ;;  %v603_v12 = vld [vmem:[#allocation7 + $0x2c] ss:$20 sps:$4 sm:$0xff]   ;;  %v605_v13 = vld [vmem:[#allocation7 + $0x28] ss:$20 sps:$4 sm:$0xff]   ;;  %v609_v15 = vld [vmem:[#allocation7 + $0x10] ss:$20 sps:$4 sm:$0xff]  }
  0x50   :  { %270 = vmatprep.subr.bf16.mxu1 %v603_v12  ;;  %v606_v16 = vld [vmem:[#allocation7 + $0x30] ss:$20 sps:$4 sm:$0xff]   ;;  %v790_v17 = vmov 0.0   ;;  %v612_v18 = vld [vmem:[#allocation8 + $0x4] ss:$8 sps:$4 sm:$0xff]   ;;  %vm791_vm1 = vmmov 0  }
  0x51   :  { %v613_v19 = vld [vmem:[#allocation7 + $0x38] ss:$20 sps:$4 sm:$0xff]   ;;  %v614_v22 = vld [vmem:[#allocation8 + $0x10] ss:$8 sps:$4 sm:$0xff]   ;;  %v97_v24 = vshrl.u32 %v96_v23, 7  ;;  %s792_s19 = smov [#allocation10]  }
  0x52   :  { %133 = vmatpush1.bf16.msra.mxu0 %v596_v4  ;;  %v610_v20 = vld [vmem:[#allocation8] ss:$8 sps:$4 sm:$0xff]   ;;  %v616_v21 = vld [vmem:[#allocation8 + $0x14] ss:$8 sps:$4 sm:$0xff]   ;;  %s494_s20 = sshll.u32 %s792_s19, 4  ;;  %s932_s20 = int_to_ptr.vmem [resolvable:$true] %s494_s20 }
  0x53   :  { %311 = vmatprep.subr.bf16.mxu0 %v602_v10  ;;  %271 = vmatpush1.bf16.msra.mxu1 %v605_v13  ;;  %v918_v25 = vsub.s32 0, %v97_v24  ;;  %v94_v26 = vld [vmem:[%s997_s2] sm:$0x3]  ;;  %v923_v27 = vsub.s32 1, %v97_v24  ;;  %v201_v36 = vsub.s32 2, %v97_v24  ;;  %v205_v39 = vsub.s32 3, %v97_v24  ;;  %p710_p5 = scmp.lt.s32.totalorder %s932_s20, %s932_s20 }
  0x54   :  { %565 = vmatprep.subr.bf16.mxu1 %v790_v17  ;;  %v189_v29 = vld [vmem:[%s999_s4] sm:$0x1f]  ;;  %v209_v46 = vsub.s32 4, %v97_v24  ;;  %s705_s2 = scalar_lea.vmem %s932_s20, 512 }
  0x55   :  { %543 = vmatmul.mubr.msk.bf16.vlgmr.msra.gmra.mrb[0].mxu0 %vm126_vm0, %v89_v11  ;;  %v99_v28 = vrot.slane %v94_v26, %v918_v25  ;;  %v103_v30 = vrot.slane %v94_v26, %v923_v27  ;;  %v194_v32 = vrot.slane %v189_v29, %v918_v25  ;;  %v198_v35 = vrot.slane %v189_v29, %v923_v27  ;;  %p706_p4 = scmp.ne.s32.totalorder %s932_s20, %s705_s2  ;;  %p711_p6 = scmp.lt.s32.totalorder %s705_s2, %s705_s2 }
  0x56   :  { %312 = vmatpush1.bf16.msra.mxu0 %v600_v9  ;;  %343 = vmatprep.mubr.bf16.mxu0 %v789_v0  ;;  %v202_v49 = vrot.slane %v189_v29, %v201_v36  ;;  %v206_v52 = vrot.slane %v189_v29, %v205_v39 }
  0x57   :  { %313 = vmatprep.subr.bf16.mxu0 %v608_v14  ;;  %554 = vmatmul.mubr.msk.bf16.vlgmr.msra.gmra.mrb[0].mxu1 %vm126_vm0, %v89_v11  ;;  %p712_p7 = por %p711_p6, %p710_p5 }
  0x58   :  { %566 = vmatpush3.bf16.msra.mxu1 %v609_v15  ;;  %569 = vmatprep.mubr.msk.bf16.mxu1 %vm791_vm1, %v790_v17 }
  0x59   :  { %567 = vmatprep.subr.bf16.mxu1 %v790_v17  ;;  %p713_p8 = pnand %p712_p7, %p706_p4 }
  0x5a   :  { %314 = vmatpush1.bf16.msra.mxu0 %v606_v16 }
  0x5b   :  { %441 = vmatprep.subr.bf16.mxu0 %v612_v18 }
  0x5c   :  { %568 = vmatpush3.bf16.msra.mxu1 %v613_v19 }
  0x5d   :  { %555 = vmatmul.mubr.msk.bf16.vlgmr.msra.gmra.mrb[4].mxu0 %vm126_vm0, %v89_v11 }
  0x5e   :  { %442 = vmatpush1.bf16.msra.mxu0 %v610_v20  ;;  %473 = vmatprep.mubr.bf16.mxu0 %v789_v0 }
  0x5f   :  { %443 = vmatprep.subr.bf16.mxu0 %v616_v21  ;;  %570 = vmatmul.mubr.msk.bf16.vlgmr.msra.gmra.mrb[4].mxu1 %vm126_vm0, %v89_v11 }
  0x62   :  { %444 = vmatpush1.bf16.msra.mxu0 %v614_v22 }
  0x65   :  { %561 = vmatmul.mubr.msk.bf16.vlgmr.msra.gmra.mrb[8].mxu0 %vm126_vm0, %v89_v11 }
 0x128   :  { %v164_v31 = vpop.f32.mrb[0].mxu0 }
 0x129   :  { %v165_v33 = vadd.f32 %v164_v31, %v99_v28  ;;  %v166_v34 = vpop.f32.mrb[1].mxu0 }
 0x12a   :  { %v167_v37 = vadd.f32 %v166_v34, %v103_v30  ;;  %v168_v38 = vpop.f32.mrb[2].mxu0  ;;  %v302_v42 = vpop.f32.mrb[0].mxu1 }
 0x12b   :  { %173 = vst [vmem:[#allocation10] sm:$0xff] %v165_v33  ;;  %v169_v40 = vadd.f32 %v168_v38, %v99_v28  ;;  %v170_v41 = vpop.f32.mrb[3].mxu0  ;;  %v303_v44 = vadd.f32 %v302_v42, %v194_v32  ;;  %v304_v45 = vpop.f32.mrb[1].mxu1 }
 0x12c   :  { %174 = vst [vmem:[#allocation10 + $0x8] sm:$0xff] %v167_v37  ;;  %v171_v43 = vadd.f32 %v170_v41, %v103_v30  ;;  %v305_v47 = vadd.f32 %v304_v45, %v198_v35  ;;  %v306_v48 = vpop.f32.mrb[2].mxu1 }
 0x12d   :  { %175 = vst [vmem:[#allocation10 + $0x10] sm:$0xff] %v169_v40  ;;  %395 = vst [vmem:[#allocation11] sm:$0xff] %v303_v44  ;;  %v307_v50 = vadd.f32 %v306_v48, %v194_v32  ;;  %v308_v51 = vpop.f32.mrb[3].mxu1 }
 0x12e   :  { %176 = vst [vmem:[#allocation10 + $0x18] sm:$0xff] %v171_v43  ;;  %396 = vst [vmem:[#allocation11 + $0x8] sm:$0xff] %v305_v47  ;;  %v309_v53 = vadd.f32 %v308_v51, %v198_v35 }
 0x12f   :  { %716 = shalt.err (!%p713_p8)
}
 0x130   :  { %s717_s24 = scalar_lea.hbm %s1002_s7, 512 }
 0x131   :  { %p718_p9 = scmp.ne.s32.totalorder %s1002_s7, %s717_s24  ;;  %p721_p10 = scmp.lt.u32.totalorder %s717_s24, %s1002_s7 }
 0x133   :  { %p723_p11 = pnand %p721_p10, %p718_p9 }
 0x135   :  { %726 = shalt.err (!%p723_p11)
}
 0x136   :  { %s793_s27 = smov 256   ;;  %s794_s28 = smov 16   ;;  %400 = vst [vmem:[#allocation11 + $0x28] sm:$0xff] %v307_v50  ;;  %v345_v54 = vpop.f32.mrb[4].mxu0  ;;  %v210_v55 = vrot.slane %v189_v29, %v209_v46  ;;  %401 = vst [vmem:[#allocation11 + $0x30] sm:$0xff] %v309_v53  ;;  %v388_v63 = vpop.f32.mrb[4].mxu1 }
 0x137   :  { %500 = dma.vmem_to_hbm [thread:$0]  %s932_s20, 512, %s1002_s7, [#allocation4], %s793_s27, %s793_s27, %s794_s28   ;;  %v346_v56 = vadd.f32 %v345_v54, %v202_v49  ;;  %v347_v57 = vpop.f32.mrb[5].mxu0  ;;  %v571_v2 = vpop.f32.mrb[5].mxu1  ;;  %vm485_vm2 = vcmask 916480  }
 0x138   :  { %v348_v58 = vadd.f32 %v347_v57, %v206_v52  ;;  %v349_v59 = vpop.f32.mrb[6].mxu0  ;;  %v409_v60 = vld [vmem:[%s1001_s6] sm:$0x3]  ;;  %s795_s1 = smov [#allocation11]   ;;  %v389_v1 = vadd.f32 %v388_v63, %v210_v55  ;;  %v391_v3 = vpop.f32.mrb[6].mxu1  ;;  %s796_s6 = smov [#allocation13]  }
 0x139   :  { %s506_s10 = sshll.u32 %s795_s1, 4  ;;  %397 = vst [vmem:[#allocation11 + $0x10] sm:$0xff] %v346_v56  ;;  %v350_v61 = vadd.f32 %v349_v59, %v202_v49  ;;  %v351_v62 = vpop.f32.mrb[7].mxu0  ;;  %v414_v4 = vrot.slane %v409_v60, %v918_v25  ;;  %v392_v5 = vadd.f32 %v391_v3, %v210_v55  ;;  %v572_v6 = vpop.f32.mrb[7].mxu1  ;;  %v418_v7 = vrot.slane %v409_v60, %v923_v27  ;;  %s518_s7 = sshll.u32 %s796_s6, 4  ;;  %s958_s10 = int_to_ptr.vmem [resolvable:$true] %s506_s10  ;;  %s519_s7 = int_to_ptr.vmem [resolvable:$true] %s518_s7 }
 0x13a   :  { %398 = vst [vmem:[#allocation11 + $0x18] sm:$0xff] %v348_v58  ;;  %v352_v0 = vadd.f32 %v351_v62, %v206_v52  ;;  %399 = vst [vmem:[#allocation11 + $0x20] sm:$0xff] %v389_v1  ;;  %v475_v8 = vpop.f32.mrb[8].mxu0  ;;  %s727_s14 = scalar_lea.vmem %s958_s10, 1280  ;;  %p732_p13 = scmp.lt.s32.totalorder %s958_s10, %s958_s10 }
 0x13b   :  { %402 = vst [vmem:[#allocation11 + $0x38] sm:$0xff] %v350_v61  ;;  %404 = vst [vmem:[#allocation11 + $0x48] sm:$0xff] %v392_v5  ;;  %v476_v9 = vadd.f32 %v475_v8, %v414_v4  ;;  %v477_v10 = vpop.f32.mrb[9].mxu0  ;;  %p728_p12 = scmp.ne.s32.totalorder %s958_s10, %s727_s14  ;;  %p733_p0 = scmp.lt.s32.totalorder %s727_s14, %s727_s14 }
 0x13c   :  { %403 = vst [vmem:[#allocation11 + $0x40] sm:$0xff] %v352_v0 }
 0x13d   :  { %p734_p1 = por %p733_p0, %p732_p13 }
 0x13f   :  { %p735_p2 = pnand %p734_p1, %p728_p12 }
 0x141   :  { %738 = shalt.err (!%p735_p2)
}
 0x142   :  { %s739_s3 = scalar_lea.hbm %s1003_s8, 1280 }
 0x143   :  { %p740_p3 = scmp.ne.s32.totalorder %s1003_s8, %s739_s3  ;;  %p743_p4 = scmp.lt.u32.totalorder %s739_s3, %s1003_s8 }
 0x145   :  { %p745_p5 = pnand %p743_p4, %p740_p3 }
 0x147   :  { %748 = shalt.err (!%p745_p5)
}
 0x148   :  { %s797_s18 = smov 640   ;;  %s798_s19 = smov 40   ;;  %v478_v11 = vadd.f32 %v477_v10, %v418_v7  ;;  %v479_v12 = vpop.f32.mrb[10].mxu0  ;;  %484 = vst [vmem:[#allocation13] sm:$0xff] %v476_v9 }
 0x149   :  { %512 = dma.vmem_to_hbm [thread:$0]  %s958_s10, 1280, %s1003_s8, [#allocation12], %s797_s18, %s797_s18, %s798_s19   ;;  %v480_v13 = vadd.f32 %v479_v12, %v414_v4  ;;  %v481_v14 = vpop.f32.mrb[11].mxu0 }
 0x14a   :  { %486 = vst.msk [vmem:[#allocation13 + $0x8] sm:$0xff] %vm485_vm2, %v478_v11  ;;  %v482_v15 = vadd.f32 %v481_v14, %v418_v7  ;;  %s749_s4 = scalar_lea.vmem %s519_s7, 512  ;;  %p754_p7 = scmp.lt.s32.totalorder %s519_s7, %s519_s7 }
 0x14b   :  { %487 = vst [vmem:[#allocation13 + $0x10] sm:$0xff] %v480_v13  ;;  %p750_p6 = scmp.ne.s32.totalorder %s519_s7, %s749_s4  ;;  %p755_p8 = scmp.lt.s32.totalorder %s749_s4, %s749_s4 }
 0x14c   :  { %488 = vst.msk [vmem:[#allocation13 + $0x18] sm:$0xff] %vm485_vm2, %v482_v15 }
 0x14d   :  { %p756_p9 = por %p755_p8, %p754_p7 }
 0x14f   :  { %p757_p10 = pnand %p756_p9, %p750_p6 }
 0x151   :  { %760 = shalt.err (!%p757_p10)
}
 0x152   :  { %s761_s24 = scalar_lea.hbm %s1004_s9, 512 }
 0x153   :  { %p762_p11 = scmp.ne.s32.totalorder %s1004_s9, %s761_s24  ;;  %p765_p12 = scmp.lt.u32.totalorder %s761_s24, %s1004_s9 }
 0x155   :  { %p767_p13 = pnand %p765_p12, %p762_p11 }
 0x157   :  { %770 = shalt.err (!%p767_p13)
}
 0x158   :  { %524 = dma.vmem_to_hbm [thread:$0]  %s519_s7, 512, %s1004_s9, [#allocation12], %s793_s27, %s793_s27, %s794_s28  }
 0x159   :  { %777 = dma.done.wait [#allocation4], 512  }
 0x15a   :  { %778 = vsyncadd [#allocation4], 4294966784 }
 0x15b   :  { %779 = dma.done.wait [#allocation12], 1792  }
 0x15c   :  { %780 = vsyncadd [#allocation12], 4294965504 }
 0x15d   :  { %534 = vsyncpa [#allocation3], 1 }
 0x15e   :  { %535 = vsyncpa [#allocation6], 1 }
 0x15f   :  { %536 = vsyncpa [#allocation9], 1 }
 0x160   :  { %537 = vsyncpa [#allocation4], 1 }
 0x161   :  { %538 = vsyncpa [#allocation12], 1 }

</bundles_post_ra>
